<compile_context>
chip_gen: v7x
topology: tpu7x:2x2x1
jax: 0.10.0
libtpu: 0.0.40
codegen_flags: <defaults>
</compile_context>

<pallas_src>
import jax
import jax.numpy as jnp
from jax.experimental import pallas as pl
from jax.experimental.pallas import tpu as pltpu

LANE = 128                          # lane width of every packed block
BIAS_ROWS = 16                      # bias region rows (bf16 tile-aligned)
SLAB_ROWS = 4 * LANE + BIAS_ROWS    # 4 weight blocks + bias tile = 528 rows
OUT = 8                             # output lanes (q1 = lane 0, q2 = lane 1)


def _round_up(x, m):
    return (x + m - 1) // m * m


def _sublane_multiple(dtype):
    # native sublane granularity: 8 rows * 32-bit packing factor
    return 8 * (4 // jnp.dtype(dtype).itemsize)   # f32 -> 8, bf16 -> 16


# ---------------------------------------------------------------------------
# Kernel: one batch tile per grid step, all weights from a single VMEM slab.
# ---------------------------------------------------------------------------
def sac_critic_kernel(obs_ref, act_ref, w_ref, o_ref):
    cdt = w_ref.dtype                       # streaming / MXU-input dtype
    obs = obs_ref[...].astype(cdt)          # (TB, obs_dim)
    act = act_ref[...].astype(cdt)          # (TB, act_dim)
    k_obs = obs.shape[1]
    k_act = act.shape[1]

    # Static, tile-aligned views into the packed parameter slab.
    we = w_ref[0:k_obs, :]                          # encoder weight      (obs_dim, 128)
    wf = w_ref[1 * LANE:2 * LANE, :]                # fused hidden (feat) (128, 128) [W1f|W2f]
    wa = w_ref[2 * LANE:2 * LANE + k_act, :]        # fused hidden (act)  (act_dim, 128) [W1a|W2a]
    wo = w_ref[3 * LANE:4 * LANE, 0:OUT]            # output weights      (128, OUT)
    b = w_ref[4 * LANE:4 * LANE + BIAS_ROWS, :].astype(jnp.float32)
    be, bh, bo = b[0:1, :], b[1:2, :], b[2:3, 0:OUT]

    # encoder: feat = relu(obs @ We + be); lanes >= feat_dim stay exactly 0.
    feat = jnp.dot(obs, we, preferred_element_type=jnp.float32)
    feat = jnp.maximum(feat + be, 0.0).astype(cdt)                    # (TB, 128)

    # fused Q1/Q2 hidden layer: h = relu(feat @ Wf + act @ Wa + bh)
    h = (jnp.dot(feat, wf, preferred_element_type=jnp.float32)
         + jnp.dot(act, wa, preferred_element_type=jnp.float32)
         + bh)
    h = jnp.maximum(h, 0.0).astype(cdt)                               # (TB, 128)

    # narrow output: lane 0 = Q1, lane 1 = Q2, lanes 2..7 exactly 0.
    q = jnp.dot(h, wo, preferred_element_type=jnp.float32) + bo       # (TB, OUT)
    o_ref[...] = q.astype(o_ref.dtype)


# ---------------------------------------------------------------------------
# Parameter packing (one-time, amortized across forward calls).
# ---------------------------------------------------------------------------
def pack_params(params, obs_dim, act_dim, feat_dim, hidden, dtype=jnp.float32):
    """Pack the 12 parameter tensors into one (528, 128) tile-aligned slab.

    Row layout (all unused entries are exactly zero):
      [  0:128)  encoder weight            (rows 0:obs_dim used)
      [128:256)  hidden weights, feat part [W1f | W2f]  (cols 0:H | H:2H)
      [256:384)  hidden weights, act  part [W1a | W2a]
      [384:512)  output weights: W1o col 0 (rows 0:H), W2o col 1 (rows H:2H)
      [512:528)  biases: row 0 encoder, row 1 hidden (q1|q2), row 2 output
    """
    (we, be, w1f, w1a, b1, w1o, b1o, w2f, w2a, b2, w2o, b2o) = params
    H = hidden
    assert obs_dim <= LANE and act_dim <= LANE, "obs/act dim must be <= 128"
    assert feat_dim <= LANE and 2 * H <= LANE, "feat_dim <= 128, hidden <= 64"
    # TODO(synk): hidden > 64 (e.g. SAC's common hidden=256) needs a wider /
    # multi-block slab layout; not supported by this packing.

    slab = jnp.zeros((SLAB_ROWS, LANE), jnp.float32)
    slab = slab.at[0:obs_dim, 0:feat_dim].set(we)
    slab = slab.at[LANE:LANE + feat_dim, 0:H].set(w1f)
    slab = slab.at[LANE:LANE + feat_dim, H:2 * H].set(w2f)
    slab = slab.at[2 * LANE:2 * LANE + act_dim, 0:H].set(w1a)
    slab = slab.at[2 * LANE:2 * LANE + act_dim, H:2 * H].set(w2a)
    slab = slab.at[3 * LANE:3 * LANE + H, 0:1].set(w1o)
    slab = slab.at[3 * LANE + H:3 * LANE + 2 * H, 1:2].set(w2o)
    slab = slab.at[4 * LANE + 0, 0:feat_dim].set(be[0])
    slab = slab.at[4 * LANE + 1, 0:H].set(b1[0])
    slab = slab.at[4 * LANE + 1, H:2 * H].set(b2[0])
    slab = slab.at[4 * LANE + 2, 0:1].set(b1o[0])
    slab = slab.at[4 * LANE + 2, 1:2].set(b2o[0])
    return slab.astype(dtype)


# ---------------------------------------------------------------------------
# Forward wrapper.
# ---------------------------------------------------------------------------
def _pad_last_dim(x, mult):
    d = x.shape[-1]
    dp = _round_up(d, mult)
    if dp == d:
        return x
    return jnp.pad(x, ((0, 0), (0, dp - d)))


def _batch_tile(B):
    if B <= 256:
        return B                     # single step; block == full array dims
    # Large batch: big tiles for HBM roofline / step-overhead amortization,
    # >= 2 grid steps so "parallel" axis shards across v7x's 2 TensorCores.
    return min(2048, _round_up(pl.cdiv(B, 2), 8))


def sac_critic_forward(obs, act, slab):
    """Return (Q1, Q2), each (B, 1) float32, given the packed parameter slab."""
    B = obs.shape[0]
    # Align obs/act feature dims to the slab's sublane granularity so every
    # in-kernel weight slice stays tile-aligned (no-op for typical dims).
    mult = _sublane_multiple(slab.dtype)
    obs = _pad_last_dim(obs, mult)
    act = _pad_last_dim(act, mult)
    obs_dim = obs.shape[1]
    act_dim = act.shape[1]
    assert obs_dim <= LANE and act_dim <= LANE

    TB = _batch_tile(B)
    grid = (pl.cdiv(B, TB),)

    out = pl.pallas_call(
        sac_critic_kernel,
        out_shape=jax.ShapeDtypeStruct((B, OUT), jnp.float32),
        grid_spec=pltpu.PrefetchScalarGridSpec(
            num_scalar_prefetch=0,
            grid=grid,
            in_specs=[
                pl.BlockSpec((TB, obs_dim), lambda i: (i, 0)),       # obs rows
                pl.BlockSpec((TB, act_dim), lambda i: (i, 0)),       # act rows
                pl.BlockSpec((SLAB_ROWS, LANE), lambda i: (0, 0)),   # weights resident
            ],
            out_specs=pl.BlockSpec((TB, OUT), lambda i: (i, 0)),
        ),
        compiler_params=pltpu.CompilerParams(
            dimension_semantics=("parallel",)),
    )(obs, act, slab)

    return out[:, 0:1], out[:, 1:2]


# ---------------------------------------------------------------------------
# Parameter init (torch.nn.Linear-style uniform) and pure-JAX reference.
# ---------------------------------------------------------------------------
def init_params(key, obs_dim, act_dim, feat_dim, hidden):
    ks = jax.random.split(key, 5)

    def lin(k, fan_in, fan_out):
        bound = 1.0 / jnp.sqrt(fan_in)
        kw, kb = jax.random.split(k)
        w = jax.random.uniform(kw, (fan_in, fan_out), jnp.float32, -bound, bound)
        b = jax.random.uniform(kb, (1, fan_out), jnp.float32, -bound, bound)
        return w, b

    we, be = lin(ks[0], obs_dim, feat_dim)

    w1, b1 = lin(ks[1], feat_dim + act_dim, hidden)
    w1f, w1a = w1[:feat_dim], w1[feat_dim:]
    w1o, b1o = lin(ks[2], hidden, 1)

    w2, b2 = lin(ks[3], feat_dim + act_dim, hidden)
    w2f, w2a = w2[:feat_dim], w2[feat_dim:]
    w2o, b2o = lin(ks[4], hidden, 1)

    return (we, be,
            w1f, w1a, b1, w1o, b1o,
            w2f, w2a, b2, w2o, b2o)


def reference_forward(obs, act, params):
    (we, be, w1f, w1a, b1, w1o, b1o, w2f, w2a, b2, w2o, b2o) = params
    feat = jnp.maximum(obs @ we + be, 0.0)
    x1 = jnp.concatenate([feat, act], -1)
    w1 = jnp.concatenate([w1f, w1a], 0)
    w2 = jnp.concatenate([w2f, w2a], 0)
    q1 = jnp.maximum(x1 @ w1 + b1, 0.0) @ w1o + b1o
    q2 = jnp.maximum(x1 @ w2 + b2, 0.0) @ w2o + b2o
    return q1, q2


if __name__ == "__main__":
    B, obs_dim, act_dim, feat_dim, hidden = 8, 16, 8, 32, 32

    key = jax.random.PRNGKey(0)
    k_obs, k_act, k_par = jax.random.split(key, 3)
    obs = jax.random.normal(k_obs, (B, obs_dim), jnp.float32)
    act = jax.random.normal(k_act, (B, act_dim), jnp.float32)
    params = init_params(k_par, obs_dim, act_dim, feat_dim, hidden)
    q1_ref, q2_ref = reference_forward(obs, act, params)

    # f32 streaming path (exactness check; default for v5e).
    slab_f32 = pack_params(params, obs_dim, act_dim, feat_dim, hidden, jnp.float32)
    q1, q2 = sac_critic_forward(obs, act, slab_f32)
    q1 = jax.block_until_ready(q1)
    q2 = jax.block_until_ready(q2)
    assert q1.shape == (B, 1) and q2.shape == (B, 1)
    assert jnp.allclose(q1, q1_ref, atol=2e-4, rtol=2e-4)
    assert jnp.allclose(q2, q2_ref, atol=2e-4, rtol=2e-4)

    # bf16 streaming path (halves HBM bytes on v6e/v7x; f32 accumulation).
    slab_bf16 = pack_params(params, obs_dim, act_dim, feat_dim, hidden, jnp.bfloat16)
    q1b, q2b = sac_critic_forward(obs.astype(jnp.bfloat16),
                                  act.astype(jnp.bfloat16), slab_bf16)
    q1b = jax.block_until_ready(q1b)
    q2b = jax.block_until_ready(q2b)
    assert q1b.shape == (B, 1) and q2b.shape == (B, 1)
    assert jnp.allclose(q1b, q1_ref, atol=3e-2, rtol=3e-2)
    assert jnp.allclose(q2b, q2_ref, atol=3e-2, rtol=3e-2)

    print("KERNEL_OK")
</pallas_src>

<mosaic_0001>
module attributes {stable_mosaic.version = 11 : i64} {
  func.func @sac_critic_kernel(%arg0: i32, %arg1: memref<8x16xf32, #tpu.memory_space<vmem>>, %arg2: memref<8x8xf32, #tpu.memory_space<vmem>>, %arg3: memref<528x128xf32, #tpu.memory_space<vmem>>, %arg4: memref<8x8xf32, #tpu.memory_space<vmem>>) attributes {dimension_semantics = [#tpu.dimension_semantics<parallel>], iteration_bounds = array<i64: 1>, scalar_prefetch = 0 : i64, scratch_operands = 0 : i64, tpu.core_type = #tpu.core_type<tc>, window_params = [{transform_indices = @transform_0, window_bounds = array<i64: 8, 16>}, {transform_indices = @transform_1, window_bounds = array<i64: 8, 8>}, {pipeline_mode = #tpu.pipeline_mode<synchronous>, transform_indices = @transform_2, window_bounds = array<i64: 528, 128>}, {transform_indices = @transform_3, window_bounds = array<i64: 8, 8>}]} {
    %c0 = arith.constant 0 : index
    %c0_0 = arith.constant 0 : index
    %0 = vector.load %arg1[%c0, %c0_0] : memref<8x16xf32, #tpu.memory_space<vmem>>, vector<8x16xf32>
    %c0_1 = arith.constant 0 : index
    %c0_2 = arith.constant 0 : index
    %1 = vector.load %arg2[%c0_1, %c0_2] : memref<8x8xf32, #tpu.memory_space<vmem>>, vector<8x8xf32>
    %c0_3 = arith.constant 0 : index
    %c0_4 = arith.constant 0 : index
    %2 = vector.load %arg3[%c0_3, %c0_4] : memref<528x128xf32, #tpu.memory_space<vmem>>, vector<16x128xf32>
    %c128 = arith.constant 128 : index
    %c0_5 = arith.constant 0 : index
    %3 = vector.load %arg3[%c128, %c0_5] : memref<528x128xf32, #tpu.memory_space<vmem>>, vector<128x128xf32>
    %c256 = arith.constant 256 : index
    %c0_6 = arith.constant 0 : index
    %4 = vector.load %arg3[%c256, %c0_6] : memref<528x128xf32, #tpu.memory_space<vmem>>, vector<8x128xf32>
    %c384 = arith.constant 384 : index
    %c0_7 = arith.constant 0 : index
    %5 = vector.load %arg3[%c384, %c0_7] : memref<528x128xf32, #tpu.memory_space<vmem>>, vector<128x8xf32>
    %c512 = arith.constant 512 : index
    %c0_8 = arith.constant 0 : index
    %6 = vector.load %arg3[%c512, %c0_8] : memref<528x128xf32, #tpu.memory_space<vmem>>, vector<16x128xf32>
    %7 = vector.extract_strided_slice %6 {offsets = [0, 0], sizes = [1, 128], strides = [1, 1]} : vector<16x128xf32> to vector<1x128xf32>
    %8 = vector.extract_strided_slice %6 {offsets = [1, 0], sizes = [1, 128], strides = [1, 1]} : vector<16x128xf32> to vector<1x128xf32>
    %9 = vector.extract_strided_slice %6 {offsets = [2, 0], sizes = [1, 8], strides = [1, 1]} : vector<16x128xf32> to vector<1x8xf32>
    %cst = arith.constant dense<0.000000e+00> : vector<8x128xf32>
    %10 = tpu.matmul %0, %2, %cst {dimension_numbers = #tpu.dot_dimension_numbers<[1], [0], [0], [1], [0, 0, 1, 1], [], []>} : vector<8x16xf32>, vector<16x128xf32>, vector<8x128xf32> -> vector<8x128xf32>
    %11 = vector.broadcast %7 : vector<1x128xf32> to vector<8x128xf32>
    %12 = arith.addf %10, %11 : vector<8x128xf32>
    %cst_9 = arith.constant 0.000000e+00 : f32
    %13 = vector.broadcast %cst_9 : f32 to vector<8x128xf32>
    %14 = arith.maximumf %12, %13 : vector<8x128xf32>
    %cst_10 = arith.constant dense<0.000000e+00> : vector<8x128xf32>
    %15 = tpu.matmul %14, %3, %cst_10 {dimension_numbers = #tpu.dot_dimension_numbers<[1], [0], [0], [1], [0, 0, 1, 1], [], []>} : vector<8x128xf32>, vector<128x128xf32>, vector<8x128xf32> -> vector<8x128xf32>
    %cst_11 = arith.constant dense<0.000000e+00> : vector<8x128xf32>
    %16 = tpu.matmul %1, %4, %cst_11 {dimension_numbers = #tpu.dot_dimension_numbers<[1], [0], [0], [1], [0, 0, 1, 1], [], []>} : vector<8x8xf32>, vector<8x128xf32>, vector<8x128xf32> -> vector<8x128xf32>
    %17 = arith.addf %15, %16 : vector<8x128xf32>
    %18 = vector.broadcast %8 : vector<1x128xf32> to vector<8x128xf32>
    %19 = arith.addf %17, %18 : vector<8x128xf32>
    %cst_12 = arith.constant 0.000000e+00 : f32
    %20 = vector.broadcast %cst_12 : f32 to vector<8x128xf32>
    %21 = arith.maximumf %19, %20 : vector<8x128xf32>
    %cst_13 = arith.constant dense<0.000000e+00> : vector<8x8xf32>
    %22 = tpu.matmul %21, %5, %cst_13 {dimension_numbers = #tpu.dot_dimension_numbers<[1], [0], [0], [1], [0, 0, 1, 1], [], []>} : vector<8x128xf32>, vector<128x8xf32>, vector<8x8xf32> -> vector<8x8xf32>
    %23 = vector.broadcast %9 : vector<1x8xf32> to vector<8x8xf32>
    %24 = arith.addf %22, %23 : vector<8x8xf32>
    %c0_14 = arith.constant 0 : index
    %c0_15 = arith.constant 0 : index
    %25 = vector.load %arg4[%c0_14, %c0_15] : memref<8x8xf32, #tpu.memory_space<vmem>>, vector<8x8xf32>
    tpu.vector_store %arg4[%c0_14, %c0_15], %24 {strides = array<i32>} : memref<8x8xf32, #tpu.memory_space<vmem>>, vector<8x8xf32>,
    return
  }
  func.func @transform_0(%arg0: i32) -> (i32, i32) {
    %c0_i32 = arith.constant 0 : i32
    %c0_i32_0 = arith.constant 0 : i32
    return %arg0, %c0_i32 : i32, i32
  }
  func.func @transform_1(%arg0: i32) -> (i32, i32) {
    %c0_i32 = arith.constant 0 : i32
    %c0_i32_0 = arith.constant 0 : i32
    return %arg0, %c0_i32 : i32, i32
  }
  func.func @transform_2(%arg0: i32) -> (i32, i32) {
    %c0_i32 = arith.constant 0 : i32
    %c0_i32_0 = arith.constant 0 : i32
    %c0_i32_1 = arith.constant 0 : i32
    return %c0_i32, %c0_i32_0 : i32, i32
  }
  func.func @transform_3(%arg0: i32) -> (i32, i32) {
    %c0_i32 = arith.constant 0 : i32
    %c0_i32_0 = arith.constant 0 : i32
    return %arg0, %c0_i32 : i32, i32
  }
}

</mosaic_0001>

<bundles_post_ra>
// kernel: tpu_custom_call.1
= control target key start
LH: loop header
LB: loop body
LE: loop exit
PB: predicated region body
PF: predicated region fallthrough
CT: control target
= control target key end

     0   :  { %8 = vsyncpa [#allocation3], 0  ;;  %s787_s0 = inlined_call_operand.hbm [shape: f32[8,16], index: 0, kind: input, shape index: {}]   ;;  %s788_s1 = inlined_call_operand.hbm [shape: f32[8,8], index: 1, kind: input, shape index: {}]   ;;  %s789_s2 = inlined_call_operand.hbm [shape: f32[528,128], index: 2, kind: input, shape index: {}]   ;;  %s790_s3 = inlined_call_operand.hbm [shape: f32[8,8], index: 3, kind: output, shape index: {}]  }
   0x1   :  { %9 = vsyncpa [#allocation6], 0 }
   0x2   :  { %10 = vsyncpa [#allocation4], 0  ;;  %s687_s12 = smov [#allocation5]   ;;  %s688_s14 = smov [#allocation2]  }
   0x3   :  { %s27_s13 = sshll.u32 %s687_s12, 4  ;;  %s17_s15 = sshll.u32 %s688_s14, 4  ;;  %s28_s13 = int_to_ptr.vmem [resolvable:$true] %s27_s13  ;;  %s18_s15 = int_to_ptr.vmem [resolvable:$true] %s17_s15 }
   0x4   :  { %s593_s18 = scalar_lea.hbm %s788_s1, 128 }
   0x5   :  { %p594_p0 = scmp.ne.s32.totalorder %s788_s1, %s593_s18  ;;  %p597_p1 = scmp.lt.u32.totalorder %s593_s18, %s788_s1 }
   0x7   :  { %p599_p2 = pnand %p597_p1, %p594_p0 }
   0x9   :  { %602 = shalt.err (!%p599_p2)
}
   0xa   :  { %s603_s23 = scalar_lea.vmem %s28_s13, 128  ;;  %p608_p4 = scmp.lt.s32.totalorder %s28_s13, %s28_s13 }
   0xb   :  { %p604_p3 = scmp.ne.s32.totalorder %s28_s13, %s603_s23  ;;  %p609_p5 = scmp.lt.s32.totalorder %s603_s23, %s603_s23 }
   0xd   :  { %p610_p6 = por %p609_p5, %p608_p4 }
   0xf   :  { %p611_p7 = pnand %p610_p6, %p604_p3 }
  0x11   :  { %614 = shalt.err (!%p611_p7)
}
  0x12   :  { %30 = dma.hbm_to_vmem [thread:$0]  %s788_s1, 128, %s28_s13, [#allocation6]  }
  0x13   :  { %s615_s28 = scalar_lea.hbm %s787_s0, 128 }
  0x14   :  { %p616_p8 = scmp.ne.s32.totalorder %s787_s0, %s615_s28  ;;  %p619_p9 = scmp.lt.u32.totalorder %s615_s28, %s787_s0 }
  0x16   :  { %p621_p10 = pnand %p619_p9, %p616_p8 }
  0x18   :  { %624 = shalt.err (!%p621_p10)
}
  0x19   :  { %s625_s6 = scalar_lea.vmem %s18_s15, 128  ;;  %p630_p12 = scmp.lt.s32.totalorder %s18_s15, %s18_s15 }
  0x1a   :  { %p626_p11 = scmp.ne.s32.totalorder %s18_s15, %s625_s6  ;;  %p631_p13 = scmp.lt.s32.totalorder %s625_s6, %s625_s6 }
  0x1c   :  { %p632_p0 = por %p631_p13, %p630_p12 }
  0x1e   :  { %p633_p1 = pnand %p632_p0, %p626_p11 }
  0x20   :  { %636 = shalt.err (!%p633_p1)
}
  0x21   :  { %20 = dma.hbm_to_vmem [thread:$0]  %s787_s0, 128, %s18_s15, [#allocation3]  }
  0x22   :  { %s689_s8 = smov [#allocation7]   ;;  %s637_s12 = scalar_lea.hbm %s789_s2, 8448 }
  0x23   :  { %s36_s9 = sshll.u32 %s689_s8, 4  ;;  %p638_p2 = scmp.ne.s32.totalorder %s789_s2, %s637_s12  ;;  %s37_s9 = int_to_ptr.vmem [resolvable:$true] %s36_s9 }
  0x24   :  { %p641_p3 = scmp.lt.u32.totalorder %s637_s12, %s789_s2 }
  0x26   :  { %p643_p4 = pnand %p641_p3, %p638_p2 }
  0x28   :  { %646 = shalt.err (!%p643_p4)
}
  0x29   :  { %s647_s18 = scalar_lea.vmem %s37_s9, 8448  ;;  %p652_p6 = scmp.lt.s32.totalorder %s37_s9, %s37_s9 }
  0x2a   :  { %p648_p5 = scmp.ne.s32.totalorder %s37_s9, %s647_s18  ;;  %p653_p7 = scmp.lt.s32.totalorder %s647_s18, %s647_s18 }
  0x2c   :  { %p654_p8 = por %p653_p7, %p652_p6 }
  0x2e   :  { %p655_p9 = pnand %p654_p8, %p648_p5 }
  0x30   :  { %658 = shalt.err (!%p655_p9)
}
  0x31   :  { %s690_s0 = smov 128   ;;  %s691_s15 = smov 8  }
  0x32   :  { %42 = dma.hbm_to_vmem [thread:$0]  %s789_s2, 8448, %s37_s9, [#allocation6], %s690_s0, %s690_s0, %s691_s15  }
  0x33   :  { %681 = dma.done.wait [#allocation3], 128  }
  0x34   :  { %682 = vsyncadd [#allocation3], 4294967168 }
  0x35   :  { %683 = dma.done.wait [#allocation6], 8576  }
  0x36   :  { %684 = vsyncadd [#allocation6], 4294958720  ;;  %v692_v0 = vmov 0.0|0.0   ;;  %vm693_vm0 = vmmov 0   ;;  %v694_v1 = vmov 0.0   ;;  %v54_v2 = vld [vmem:[#allocation7] sm:$0xff]  ;;  %v90_v50 = vlaneseq }
  0x37   :  { %533 = vmatprep.subr.bf16.mxu0 %v692_v0  ;;  %455 = vmatprep.mubr.msk.f32.mxu0 %vm693_vm0, %v694_v1  ;;  %v55_v3 = vld [vmem:[#allocation7 + $0x8] sm:$0xff]  ;;  %vm169_vm1 = vcmask 64512   ;;  %v72_v5 = vld [vmem:[#allocation7 + $0x100] sm:$0xff]  ;;  %v53_v6 = vld [vmem:[#allocation5] sm:$0xff]  ;;  %vm94_vm2 = vcmask 130048   ;;  %s695_s2 = smov [#allocation8]  }
  0x38   :  { %458 = vmatprep.subr.mxu1 %v694_v1  ;;  %460 = vmatprep.mubr.msk.f32.mxu1 %vm693_vm0, %v694_v1  ;;  %v534_v4 = vpack.c.bf16 %v55_v3, %v54_v2  ;;  %v56_v7 = vld [vmem:[#allocation7 + $0x80] sm:$0xff]  ;;  %v57_v8 = vld [vmem:[#allocation7 + $0x88] sm:$0xff]  ;;  %v58_v9 = vld [vmem:[#allocation7 + $0x90] sm:$0xff]  ;;  %v91_v51 = vshrl.u32 %v90_v50, 7  ;;  %s400_s21 = sshll.u32 %s695_s2, 4  ;;  %s401_s21 = int_to_ptr.vmem [resolvable:$true] %s400_s21 }
  0x39   :  { %459 = vmatpush3.msra.mxu1 %v72_v5  ;;  %v59_v10 = vld [vmem:[#allocation7 + $0x98] sm:$0xff]  ;;  %v52_v11 = vld [vmem:[#allocation2] sm:$0xff]  ;;  %v537_v12 = vpack.c.bf16 %v57_v8, %v56_v7  ;;  %v60_v14 = vld [vmem:[#allocation7 + $0xa0] sm:$0xff]  ;;  %s659_s22 = scalar_lea.vmem %s401_s21, 128  ;;  %p664_p11 = scmp.lt.s32.totalorder %s401_s21, %s401_s21 }
  0x3a   :  { %535 = vmatpush3.bf16.msra.mxu0 %v534_v4  ;;  %461 = vmatmul.mubr.msk.f32.vlgmr.msra.gmra.mrb[0].mxu1 %vm169_vm1, %v53_v6  ;;  %v540_v13 = vpack.c.bf16 %v59_v10, %v58_v9  ;;  %v61_v15 = vld [vmem:[#allocation7 + $0xa8] sm:$0xff]  ;;  %v62_v17 = vld [vmem:[#allocation7 + $0xb0] sm:$0xff]  ;;  %v63_v18 = vld [vmem:[#allocation7 + $0xb8] sm:$0xff]  ;;  %v92_v52 = vsub.s32 0, %v91_v51  ;;  %v315_v4 = vsub.s32 1, %v91_v51  ;;  %p660_p10 = scmp.ne.s32.totalorder %s401_s21, %s659_s22  ;;  %p665_p12 = scmp.lt.s32.totalorder %s659_s22, %s659_s22 }
  0x3b   :  { %536 = vmatprep.subr.bf16.mxu1 %v692_v0  ;;  %495 = vmatprep.mubr.msk.f32.mxu1 %vm693_vm0, %v694_v1  ;;  %v543_v16 = vpack.c.bf16 %v61_v15, %v60_v14  ;;  %v546_v19 = vpack.c.bf16 %v63_v18, %v62_v17  ;;  %v64_v20 = vld [vmem:[#allocation7 + $0xc0] sm:$0xff]  ;;  %v65_v21 = vld [vmem:[#allocation7 + $0xc8] sm:$0xff]  ;;  %v66_v23 = vld [vmem:[#allocation7 + $0xd0] sm:$0xff] }
  0x3c   :  { %538 = vmatpush3.bf16.msra.mxu1 %v537_v12  ;;  %560 = vmatprep.subr.bf16.mxu0 %v692_v0  ;;  %v549_v22 = vpack.c.bf16 %v65_v21, %v64_v20  ;;  %v67_v24 = vld [vmem:[#allocation7 + $0xd8] sm:$0xff]  ;;  %v68_v26 = vld [vmem:[#allocation7 + $0xe0] sm:$0xff]  ;;  %v69_v27 = vld [vmem:[#allocation7 + $0xe8] sm:$0xff]  ;;  %p666_p13 = por %p665_p12, %p664_p11 }
  0x3d   :  { %456 = vmatmul.mubr.msk.f32.vlgmr.msra.gmra.mrb[0].mxu0 %vm94_vm2, %v52_v11  ;;  %539 = vmatprep.subr.bf16.mxu1 %v692_v0  ;;  %v552_v25 = vpack.c.bf16 %v67_v24, %v66_v23  ;;  %v555_v28 = vpack.c.bf16 %v69_v27, %v68_v26  ;;  %v70_v29 = vld [vmem:[#allocation7 + $0xf0] sm:$0xff]  ;;  %v71_v30 = vld [vmem:[#allocation7 + $0xf8] sm:$0xff]  ;;  %v73_v32 = vld [vmem:[#allocation7 + $0x180] sm:$0xff]  ;;  %v321_v11 = vsub.s32 2, %v91_v51 }
  0x3e   :  { %530 = vmatprep.mubr.msk.f32.mxu0 %vm693_vm0, %v694_v1  ;;  %v558_v31 = vpack.c.bf16 %v71_v30, %v70_v29  ;;  %v74_v33 = vld [vmem:[#allocation7 + $0x188] sm:$0xff]  ;;  %v75_v34 = vld [vmem:[#allocation7 + $0x190] sm:$0xff]  ;;  %v76_v36 = vld [vmem:[#allocation7 + $0x198] sm:$0xff]  ;;  %p667_p0 = pnand %p666_p13, %p660_p10 }
  0x3f   :  { %v561_v35 = vpack.c.bf16 %v74_v33, %v73_v32  ;;  %v564_v37 = vpack.c.bf16 %v76_v36, %v75_v34  ;;  %v77_v38 = vld [vmem:[#allocation7 + $0x1a0] sm:$0xff]  ;;  %v78_v39 = vld [vmem:[#allocation7 + $0x1a8] sm:$0xff]  ;;  %v79_v41 = vld [vmem:[#allocation7 + $0x1b0] sm:$0xff] }
  0x40   :  { %541 = vmatpush3.bf16.msra.mxu1 %v540_v13  ;;  %v567_v40 = vpack.c.bf16 %v78_v39, %v77_v38  ;;  %v80_v42 = vld [vmem:[#allocation7 + $0x1b8] sm:$0xff]  ;;  %v81_v44 = vld [vmem:[#allocation7 + $0x1c0] sm:$0xff]  ;;  %v82_v45 = vld [vmem:[#allocation7 + $0x1c8] sm:$0xff] }
  0x41   :  { %542 = vmatprep.subr.bf16.mxu1 %v692_v0  ;;  %562 = vmatpush3.bf16.msra.mxu0 %v561_v35  ;;  %v570_v43 = vpack.c.bf16 %v80_v42, %v79_v41  ;;  %v573_v46 = vpack.c.bf16 %v82_v45, %v81_v44  ;;  %v83_v47 = vld [vmem:[#allocation7 + $0x1d0] sm:$0xff]  ;;  %v84_v48 = vld [vmem:[#allocation7 + $0x1d8] sm:$0xff]  ;;  %v89_v53 = vld [vmem:[#allocation7 + $0x200] sm:$0xff] }
  0x42   :  { %563 = vmatprep.subr.bf16.mxu0 %v692_v0  ;;  %v576_v49 = vpack.c.bf16 %v84_v48, %v83_v47  ;;  %v93_v54 = vrot.slane %v89_v53, %v92_v52  ;;  %v85_v61 = vld [vmem:[#allocation7 + $0x1e0] sm:$0xff]  ;;  %v86_v62 = vld [vmem:[#allocation7 + $0x1e8] sm:$0xff]  ;;  %v87_v1 = vld [vmem:[#allocation7 + $0x1f0] sm:$0xff]  ;;  %v316_v5 = vrot.slane %v89_v53, %v315_v4  ;;  %v322_v12 = vrot.slane %v89_v53, %v321_v11 }
  0x43   :  { %v579_v63 = vpack.c.bf16 %v86_v62, %v85_v61  ;;  %v88_v2 = vld [vmem:[#allocation7 + $0x1f8] sm:$0xff] }
  0x44   :  { %544 = vmatpush3.bf16.msra.mxu1 %v543_v16  ;;  %v582_v3 = vpack.c.bf16 %v88_v2, %v87_v1 }
  0x45   :  { %545 = vmatprep.subr.bf16.mxu1 %v692_v0  ;;  %565 = vmatpush3.bf16.msra.mxu0 %v564_v37 }
  0x46   :  { %566 = vmatprep.subr.bf16.mxu0 %v692_v0 }
  0x48   :  { %547 = vmatpush3.bf16.msra.mxu1 %v546_v19 }
  0x49   :  { %548 = vmatprep.subr.bf16.mxu1 %v692_v0  ;;  %568 = vmatpush3.bf16.msra.mxu0 %v567_v40 }
  0x4a   :  { %569 = vmatprep.subr.bf16.mxu0 %v692_v0 }
  0x4c   :  { %550 = vmatpush3.bf16.msra.mxu1 %v549_v22 }
  0x4d   :  { %551 = vmatprep.subr.bf16.mxu1 %v692_v0  ;;  %571 = vmatpush3.bf16.msra.mxu0 %v570_v43 }
  0x4e   :  { %572 = vmatprep.subr.bf16.mxu0 %v692_v0 }
  0x50   :  { %553 = vmatpush3.bf16.msra.mxu1 %v552_v25 }
  0x51   :  { %554 = vmatprep.subr.bf16.mxu1 %v692_v0  ;;  %574 = vmatpush3.bf16.msra.mxu0 %v573_v46 }
  0x52   :  { %575 = vmatprep.subr.bf16.mxu0 %v692_v0 }
  0x54   :  { %556 = vmatpush3.bf16.msra.mxu1 %v555_v28 }
  0x55   :  { %557 = vmatprep.subr.bf16.mxu1 %v692_v0  ;;  %577 = vmatpush3.bf16.msra.mxu0 %v576_v49 }
  0x56   :  { %578 = vmatprep.subr.bf16.mxu0 %v692_v0 }
  0x58   :  { %559 = vmatpush3.bf16.msra.mxu1 %v558_v31 }
  0x59   :  { %580 = vmatpush3.bf16.msra.mxu0 %v579_v63 }
  0x5a   :  { %581 = vmatprep.subr.bf16.mxu0 %v692_v0 }
  0x5d   :  { %583 = vmatpush3.bf16.msra.mxu0 %v582_v3 }
 0x10d   :  { %v239_v55 = vpop.f32.mrb[0].mxu1 }
 0x10e   :  { %v462_v56 = vpop.f32.mrb[1].mxu1 }
 0x110   :  { %v164_v57 = vpop.f32.mrb[0].mxu0 }
 0x111   :  { %v165_v58 = vadd.f32 %v164_v57, %v93_v54  ;;  %v457_v59 = vpop.f32.mrb[1].mxu0 }
 0x113   :  { %v168_v60 = vmax.f32 %v165_v58, 0.0 }
 0x115   :  { %496 = vmatmul.mubr.f32.vlgmr.msra.gmra.mrb[2].mxu1 %v168_v60 }
 0x1e8   :  { %v309_v6 = vpop.f32.mrb[2].mxu1 }
 0x1e9   :  { %v310_v7 = vadd.f32 %v309_v6, %v239_v55  ;;  %v497_v8 = vpop.f32.mrb[3].mxu1 }
 0x1eb   :  { %v317_v9 = vadd.f32 %v316_v5, %v310_v7 }
 0x1ed   :  { %v318_v10 = vmax.f32 %v317_v9, 0.0 }
 0x1ef   :  { %531 = vmatmul.mubr.f32.vlgmr.msra.gmra.mrb[2].mxu0 %v318_v10 }
 0x2c2   :  { %v389_v13 = vpop.f32.mrb[2].mxu0 }
 0x2c3   :  { %v390_v14 = vadd.f32 %v389_v13, %v322_v12  ;;  %v532_v15 = vpop.f32.mrb[3].mxu0 }
 0x2c5   :  { %393 = vst.msk [vmem:[#allocation8] sm:$0xff] %vm169_vm1, %v390_v14 }
 0x2c6   :  { %670 = shalt.err (!%p667_p0)
}
 0x2c7   :  { %s671_s25 = scalar_lea.hbm %s790_s3, 128 }
 0x2c8   :  { %p672_p1 = scmp.ne.s32.totalorder %s790_s3, %s671_s25  ;;  %p675_p2 = scmp.lt.u32.totalorder %s671_s25, %s790_s3 }
 0x2ca   :  { %p677_p3 = pnand %p675_p2, %p672_p1 }
 0x2cc   :  { %680 = shalt.err (!%p677_p3)
}
 0x2cd   :  { %403 = dma.vmem_to_hbm [thread:$0]  %s401_s21, 128, %s790_s3, [#allocation4]  }
 0x2ce   :  { %685 = dma.done.wait [#allocation4], 128  }
 0x2cf   :  { %686 = vsyncadd [#allocation4], 4294967168 }
 0x2d0   :  { %407 = vsyncpa [#allocation3], 1 }
 0x2d1   :  { %408 = vsyncpa [#allocation6], 1 }
 0x2d2   :  { %409 = vsyncpa [#allocation4], 1 }

</bundles_post_ra>
